<compile_context>
chip_gen: v5e
topology: v5e:2x2
jax: 0.10.0
libtpu: 0.0.40
codegen_flags: <defaults>
</compile_context>

<pallas_src>
import math
import functools

import jax
import jax.numpy as jnp
from jax.experimental import pallas as pl
from jax.experimental.pallas import tpu as pltpu

HEADS = 4
_MIB = 1024 * 1024


# ---------------------------------------------------------------------------
# Kernel
# ---------------------------------------------------------------------------
def gsa_attention_kernel(x_ref, a_ref,
                         wq_ref, wk_ref, wv_ref,
                         bq_ref, bk_ref, bv_ref,
                         wo_ref, bo_ref, gamma_ref,
                         o_ref, *, heads):
    """One grid step = a block of `Bblk` batch elements, all heads.

    x_ref  : (Bblk, N, D)          a_ref : (Bblk, N, N)
    wq/wk/wv_ref : (D, D)          bq/bk/bv_ref : (1, D)   (wq/bq pre-scaled)
    wo_ref : (D, D)                bo_ref : (1, D)
    gamma_ref : (1, 1) scalar in SMEM
    o_ref  : (Bblk, N, D)
    """
    Bblk, N, D = x_ref.shape
    H = heads
    dh = D // H
    R = Bblk * N

    # MXU operand dtype follows the model dtype: exact for f32 models (keeps
    # the 1e-4 check), bf16-native MXU for bf16 models. Accumulation is f32.
    mx_dt = x_ref.dtype

    x2d = x_ref[...].reshape(R, D)

    # Fused, full-width projections: (R, D) x (D, D) -> full MXU contraction
    # and output width.  Softmax scale already folded into wq/bq (wrapper).
    def proj(w_ref, b_ref):
        y = jnp.dot(x2d, w_ref[...], preferred_element_type=jnp.float32)
        return (y + b_ref[...]).astype(mx_dt).reshape(Bblk, N, D)

    q = proj(wq_ref, bq_ref)
    k = proj(wk_ref, bk_ref)
    v = proj(wv_ref, bv_ref)

    # Graph-structure bias: computed once per block, shared by all heads.
    ga = gamma_ref[0, 0] * a_ref[...].astype(jnp.float32)        # (Bblk, N, N)

    # Per-head attention.  Head split = static lane slice of full-width q/k/v
    # (cheap); head merge = single lane concat feeding one fat output matmul.
    head_outs = []
    for h in range(H):
        sl = slice(h * dh, (h + 1) * dh)
        s = jnp.einsum('bnd,bmd->bnm', q[:, :, sl], k[:, :, sl],
                       preferred_element_type=jnp.float32) + ga  # (Bblk, N, N)

        # Numerically-stable softmax with DEFERRED normalization: the
        # reciprocal multiplies the (N, dh) head output, not the (N, N) probs.
        s = s - jnp.max(s, axis=-1, keepdims=True)
        p = jnp.exp(s)
        denom = jnp.sum(p, axis=-1, keepdims=True)               # in [1, N]

        o_h = jnp.einsum('bnm,bmd->bnd', p.astype(mx_dt), v[:, :, sl],
                         preferred_element_type=jnp.float32)     # (Bblk, N, dh)

        r = pl.reciprocal(denom, approx=True)                    # EUP seed
        r = r * (2.0 - denom * r)                                # Newton -> f32
        head_outs.append(o_h * r)

    # Head re-interleave via one lane concat, then a single full-width output
    # projection (contraction D), bias added once at the end.
    o2d = jnp.concatenate(head_outs, axis=-1).reshape(R, D).astype(mx_dt)
    out = jnp.dot(o2d, wo_ref[...], preferred_element_type=jnp.float32)
    out = out + bo_ref[...]
    o_ref[...] = out.reshape(Bblk, N, D).astype(o_ref.dtype)


# ---------------------------------------------------------------------------
# VMEM-aware sizing
# ---------------------------------------------------------------------------
def _vmem_limit_bytes():
    """Generation-aware VMEM request: ~48 MiB on v7x (64 MiB physical per TC),
    ~100 MiB on v5e/v6e (128 MiB physical); always leaves compiler headroom."""
    try:
        phys = int(pltpu.get_tpu_info().vmem_capacity_bytes)
    except Exception:
        phys = 64 * _MIB                      # conservative (v7x-sized) fallback
    return int(max(32 * _MIB, min(phys - 16 * _MIB, 100 * _MIB)))


def _bytes_per_batch_elem(N, D, itemsize):
    """Per-batch-element VMEM footprint of one grid step."""
    # Pipeline blocks (double-buffered by Pallas): x, out, A_phi.
    pipe = 2 * (2 * N * D + N * N) * itemsize
    # Live f32 intermediates: q/k/v + concat head outs (+slack), gamma*A,
    # per-head s/p (+slack).
    live = (5 * N * D + 4 * N * N) * 4
    return pipe + live


def _pick_block_b(B, N, D, itemsize, vmem_limit, weight_bytes, min_steps=4):
    """Largest divisor of B such that (a) the per-step footprint stays within
    ~half of the requested VMEM (headroom for spills / compiler scratch) and
    (b) there are at least `min_steps` grid steps, so both v7x TensorCores get
    >= 2 steps each and the BlockSpec pipeline has DMA to hide."""
    per_b = _bytes_per_batch_elem(N, D, itemsize)
    budget = max(per_b, vmem_limit // 2 - weight_bytes)
    cap_vmem = max(1, budget // per_b)
    cap_steps = max(1, B // min_steps)
    cap = max(1, min(cap_vmem, cap_steps, B))
    for cand in range(int(cap), 0, -1):
        if B % cand == 0:
            return cand
    return 1


# ---------------------------------------------------------------------------
# Wrapper
# ---------------------------------------------------------------------------
def gsa_attention(x, a_phi, w_qkv, b_qkv, w_out, b_out, gamma, *,
                  heads=HEADS, block_b=None):
    B, N, D = x.shape
    H = heads
    assert D % H == 0, "embed dim must be divisible by heads"

    # ---- one-time wrapper-side weight plumbing (free) ----
    scale = D ** (-0.5)                       # PyTorch module uses dim ** -0.5
    wq = w_qkv[:, 0 * D:1 * D] * scale        # fold softmax scale into Wq / bq
    wk = w_qkv[:, 1 * D:2 * D]
    wv = w_qkv[:, 2 * D:3 * D]
    bq = b_qkv[:, 0 * D:1 * D] * scale
    bk = b_qkv[:, 1 * D:2 * D]
    bv = b_qkv[:, 2 * D:3 * D]

    itemsize = jnp.dtype(x.dtype).itemsize
    vmem_limit = _vmem_limit_bytes()
    # Constant-index weight/bias blocks still get two pipeline buffers;
    # budget them at 2x when sizing block_b.
    weight_bytes = 2 * (4 * D * D + 4 * D) * jnp.dtype(w_qkv.dtype).itemsize
    if block_b is None:
        block_b = _pick_block_b(B, N, D, itemsize, vmem_limit, weight_bytes)
    assert B % block_b == 0, "block_b must divide batch"

    kernel = functools.partial(gsa_attention_kernel, heads=H)
    grid = (B // block_b,)

    in_specs = [
        pl.BlockSpec((block_b, N, D), lambda b: (b, 0, 0)),     # x
        # TODO(synk): flash-style KV tiling (inner "arbitrary" grid axis +
        # online softmax) is needed here once N is large enough that even
        # block_b=1 cannot hold the (N, N) score block in VMEM.
        pl.BlockSpec((block_b, N, N), lambda b: (b, 0, 0)),     # A_phi
        pl.BlockSpec((D, D), lambda b: (0, 0)),                 # W_q (pre-scaled)
        pl.BlockSpec((D, D), lambda b: (0, 0)),                 # W_k
        pl.BlockSpec((D, D), lambda b: (0, 0)),                 # W_v
        pl.BlockSpec((1, D), lambda b: (0, 0)),                 # b_q (pre-scaled)
        pl.BlockSpec((1, D), lambda b: (0, 0)),                 # b_k
        pl.BlockSpec((1, D), lambda b: (0, 0)),                 # b_v
        pl.BlockSpec((D, D), lambda b: (0, 0)),                 # W_out
        pl.BlockSpec((1, D), lambda b: (0, 0)),                 # b_out
        pl.BlockSpec(memory_space=pltpu.MemorySpace.SMEM),      # gamma (1,1)
    ]

    return pl.pallas_call(
        kernel,
        out_shape=jax.ShapeDtypeStruct((B, N, D), x.dtype),
        grid=grid,
        in_specs=in_specs,
        out_specs=pl.BlockSpec((block_b, N, D), lambda b: (b, 0, 0)),
        compiler_params=pltpu.CompilerParams(
            dimension_semantics=("parallel",),
            vmem_limit_bytes=vmem_limit,
        ),
    )(x, a_phi, wq, wk, wv, bq, bk, bv, w_out, b_out, gamma)


# ---------------------------------------------------------------------------
# Pure-JAX reference (mirrors the PyTorch GSA_Attention forward exactly)
# ---------------------------------------------------------------------------
def gsa_attention_ref(x, a_phi, w_qkv, b_qkv, w_out, b_out, gamma, *, heads=HEADS):
    B, N, D = x.shape
    scale = D ** (-0.5)
    qkv = x @ w_qkv + b_qkv[0]                               # (B, N, 3D)
    q, k, v = jnp.split(qkv, 3, axis=-1)

    def to_heads(t):
        return t.reshape(B, N, heads, -1).transpose(0, 2, 1, 3)   # (B, H, N, dh)

    q, k, v = map(to_heads, (q, k, v))
    attn = jnp.einsum("bhqd,bhkd->bhqk", q, k) * scale
    attn = attn + gamma[0, 0] * a_phi[:, None, :, :]
    attn = jax.nn.softmax(attn, axis=-1)
    out = jnp.einsum("bhqk,bhkd->bhqd", attn, v)
    out = out.transpose(0, 2, 1, 3).reshape(B, N, D)
    return out @ w_out + b_out[0]


if __name__ == "__main__":
    B, N, D = 2, 8, 32
    heads = HEADS
    key = jax.random.PRNGKey(0)
    kx, ka, k1, k2, k3, k4 = jax.random.split(key, 6)

    x = jax.random.normal(kx, (B, N, D), dtype=jnp.float32)
    a_phi = jax.random.normal(ka, (B, N, N), dtype=jnp.float32)

    # Deterministic "Linear"-style init (uniform in +/- 1/sqrt(fan_in)).
    bound = 1.0 / math.sqrt(D)
    w_qkv = jax.random.uniform(k1, (D, 3 * D), jnp.float32, -bound, bound)
    b_qkv = jax.random.uniform(k2, (1, 3 * D), jnp.float32, -bound, bound)
    w_out = jax.random.uniform(k3, (D, D), jnp.float32, -bound, bound)
    b_out = jax.random.uniform(k4, (1, D), jnp.float32, -bound, bound)
    gamma = jnp.ones((1, 1), dtype=jnp.float32)   # nn.Parameter(torch.tensor(1.0))

    out = gsa_attention(x, a_phi, w_qkv, b_qkv, w_out, b_out, gamma, heads=heads)
    out = jax.block_until_ready(out)

    ref = gsa_attention_ref(x, a_phi, w_qkv, b_qkv, w_out, b_out, gamma, heads=heads)
    assert out.shape == (B, N, D)
    assert jnp.allclose(out, ref, atol=1e-4, rtol=1e-4), "Pallas output mismatch vs reference"

    print("KERNEL_OK")
</pallas_src>

<mosaic_0001>
module attributes {stable_mosaic.version = 11 : i64} {
  func.func @gsa_attention_kernel(%arg0: i32, %arg1: memref<1x8x32xf32, #tpu.memory_space<vmem>>, %arg2: memref<1x8x8xf32, #tpu.memory_space<vmem>>, %arg3: memref<32x32xf32, #tpu.memory_space<vmem>>, %arg4: memref<32x32xf32, #tpu.memory_space<vmem>>, %arg5: memref<32x32xf32, #tpu.memory_space<vmem>>, %arg6: memref<1x32xf32, #tpu.memory_space<vmem>>, %arg7: memref<1x32xf32, #tpu.memory_space<vmem>>, %arg8: memref<1x32xf32, #tpu.memory_space<vmem>>, %arg9: memref<32x32xf32, #tpu.memory_space<vmem>>, %arg10: memref<1x32xf32, #tpu.memory_space<vmem>>, %arg11: memref<1x1xf32, #tpu.memory_space<smem>>, %arg12: memref<1x8x32xf32, #tpu.memory_space<vmem>>) attributes {dimension_semantics = [#tpu.dimension_semantics<parallel>], iteration_bounds = array<i64: 2>, scalar_prefetch = 0 : i64, scratch_operands = 0 : i64, tpu.core_type = #tpu.core_type<tc>, window_params = [{transform_indices = @transform_0, window_bounds = array<i64: 1, 8, 32>}, {transform_indices = @transform_1, window_bounds = array<i64: 1, 8, 8>}, {pipeline_mode = #tpu.pipeline_mode<synchronous>, transform_indices = @transform_2, window_bounds = array<i64: 32, 32>}, {pipeline_mode = #tpu.pipeline_mode<synchronous>, transform_indices = @transform_3, window_bounds = array<i64: 32, 32>}, {pipeline_mode = #tpu.pipeline_mode<synchronous>, transform_indices = @transform_4, window_bounds = array<i64: 32, 32>}, {pipeline_mode = #tpu.pipeline_mode<synchronous>, transform_indices = @transform_5, window_bounds = array<i64: 1, 32>}, {pipeline_mode = #tpu.pipeline_mode<synchronous>, transform_indices = @transform_6, window_bounds = array<i64: 1, 32>}, {pipeline_mode = #tpu.pipeline_mode<synchronous>, transform_indices = @transform_7, window_bounds = array<i64: 1, 32>}, {pipeline_mode = #tpu.pipeline_mode<synchronous>, transform_indices = @transform_8, window_bounds = array<i64: 32, 32>}, {pipeline_mode = #tpu.pipeline_mode<synchronous>, transform_indices = @transform_9, window_bounds = array<i64: 1, 32>}, {transform_indices = @transform_10, window_bounds = array<i64: 1, 1>}, {transform_indices = @transform_11, window_bounds = array<i64: 1, 8, 32>}]} {
    %c0 = arith.constant 0 : index
    %c0_0 = arith.constant 0 : index
    %c0_1 = arith.constant 0 : index
    %0 = vector.load %arg1[%c0, %c0_0, %c0_1] : memref<1x8x32xf32, #tpu.memory_space<vmem>>, vector<1x8x32xf32>
    %1 = vector.shape_cast %0 : vector<1x8x32xf32> to vector<8x32xf32>
    %c0_2 = arith.constant 0 : index
    %c0_3 = arith.constant 0 : index
    %2 = vector.load %arg3[%c0_2, %c0_3] : memref<32x32xf32, #tpu.memory_space<vmem>>, vector<32x32xf32>
    %cst = arith.constant dense<0.000000e+00> : vector<8x32xf32>
    %3 = tpu.matmul %1, %2, %cst {dimension_numbers = #tpu.dot_dimension_numbers<[1], [0], [0], [1], [0, 0, 1, 1], [], []>} : vector<8x32xf32>, vector<32x32xf32>, vector<8x32xf32> -> vector<8x32xf32>
    %c0_4 = arith.constant 0 : index
    %c0_5 = arith.constant 0 : index
    %4 = vector.load %arg6[%c0_4, %c0_5] : memref<1x32xf32, #tpu.memory_space<vmem>>, vector<1x32xf32>
    %5 = vector.broadcast %4 : vector<1x32xf32> to vector<8x32xf32>
    %6 = arith.addf %3, %5 : vector<8x32xf32>
    %7 = vector.shape_cast %6 : vector<8x32xf32> to vector<1x8x32xf32>
    %c0_6 = arith.constant 0 : index
    %c0_7 = arith.constant 0 : index
    %8 = vector.load %arg4[%c0_6, %c0_7] : memref<32x32xf32, #tpu.memory_space<vmem>>, vector<32x32xf32>
    %cst_8 = arith.constant dense<0.000000e+00> : vector<8x32xf32>
    %9 = tpu.matmul %1, %8, %cst_8 {dimension_numbers = #tpu.dot_dimension_numbers<[1], [0], [0], [1], [0, 0, 1, 1], [], []>} : vector<8x32xf32>, vector<32x32xf32>, vector<8x32xf32> -> vector<8x32xf32>
    %c0_9 = arith.constant 0 : index
    %c0_10 = arith.constant 0 : index
    %10 = vector.load %arg7[%c0_9, %c0_10] : memref<1x32xf32, #tpu.memory_space<vmem>>, vector<1x32xf32>
    %11 = vector.broadcast %10 : vector<1x32xf32> to vector<8x32xf32>
    %12 = arith.addf %9, %11 : vector<8x32xf32>
    %13 = vector.shape_cast %12 : vector<8x32xf32> to vector<1x8x32xf32>
    %c0_11 = arith.constant 0 : index
    %c0_12 = arith.constant 0 : index
    %14 = vector.load %arg5[%c0_11, %c0_12] : memref<32x32xf32, #tpu.memory_space<vmem>>, vector<32x32xf32>
    %cst_13 = arith.constant dense<0.000000e+00> : vector<8x32xf32>
    %15 = tpu.matmul %1, %14, %cst_13 {dimension_numbers = #tpu.dot_dimension_numbers<[1], [0], [0], [1], [0, 0, 1, 1], [], []>} : vector<8x32xf32>, vector<32x32xf32>, vector<8x32xf32> -> vector<8x32xf32>
    %c0_14 = arith.constant 0 : index
    %c0_15 = arith.constant 0 : index
    %16 = vector.load %arg8[%c0_14, %c0_15] : memref<1x32xf32, #tpu.memory_space<vmem>>, vector<1x32xf32>
    %17 = vector.broadcast %16 : vector<1x32xf32> to vector<8x32xf32>
    %18 = arith.addf %15, %17 : vector<8x32xf32>
    %19 = vector.shape_cast %18 : vector<8x32xf32> to vector<1x8x32xf32>
    %c0_16 = arith.constant 0 : index
    %c0_17 = arith.constant 0 : index
    %20 = memref.load %arg11[%c0_16, %c0_17] : memref<1x1xf32, #tpu.memory_space<smem>>
    %c0_18 = arith.constant 0 : index
    %c0_19 = arith.constant 0 : index
    %c0_20 = arith.constant 0 : index
    %21 = vector.load %arg2[%c0_18, %c0_19, %c0_20] : memref<1x8x8xf32, #tpu.memory_space<vmem>>, vector<1x8x8xf32>
    %22 = vector.broadcast %20 : f32 to vector<1x8x8xf32>
    %23 = arith.mulf %22, %21 : vector<1x8x8xf32>
    %24 = vector.extract_strided_slice %7 {offsets = [0, 0, 0], sizes = [1, 8, 8], strides = [1, 1, 1]} : vector<1x8x32xf32> to vector<1x8x8xf32>
    %25 = vector.extract_strided_slice %13 {offsets = [0, 0, 0], sizes = [1, 8, 8], strides = [1, 1, 1]} : vector<1x8x32xf32> to vector<1x8x8xf32>
    "tpu.trace_start"() <{level = 10 : i32, message = "bnd,bmd->bnm"}> : () -> ()
    %cst_21 = arith.constant dense<0.000000e+00> : vector<1x8x8xf32>
    %26 = tpu.matmul %24, %25, %cst_21 {dimension_numbers = #tpu.dot_dimension_numbers<[2], [2], [1], [1], [0, 0, 0, 1, 1, 1], [0], [0]>} : vector<1x8x8xf32>, vector<1x8x8xf32>, vector<1x8x8xf32> -> vector<1x8x8xf32>
    "tpu.trace_stop"() : () -> ()
    %27 = arith.addf %26, %23 : vector<1x8x8xf32>
    %cst_22 = arith.constant dense<0xFF800000> : vector<1x8xf32>
    %28 = vector.multi_reduction <maximumf>, %27, %cst_22 [2] : vector<1x8x8xf32> to vector<1x8xf32>
    %29 = vector.shape_cast %28 : vector<1x8xf32> to vector<1x8x1xf32>
    %30 = vector.broadcast %29 : vector<1x8x1xf32> to vector<1x8x8xf32>
    %31 = arith.subf %27, %30 : vector<1x8x8xf32>
    %32 = math.exp %31 : vector<1x8x8xf32>
    %cst_23 = arith.constant dense<0.000000e+00> : vector<1x8xf32>
    %33 = vector.multi_reduction <add>, %32, %cst_23 [2] : vector<1x8x8xf32> to vector<1x8xf32>
    %34 = vector.shape_cast %33 : vector<1x8xf32> to vector<1x8x1xf32>
    %35 = vector.extract_strided_slice %19 {offsets = [0, 0, 0], sizes = [1, 8, 8], strides = [1, 1, 1]} : vector<1x8x32xf32> to vector<1x8x8xf32>
    "tpu.trace_start"() <{level = 10 : i32, message = "bnm,bmd->bnd"}> : () -> ()
    %cst_24 = arith.constant dense<0.000000e+00> : vector<1x8x8xf32>
    %36 = tpu.matmul %32, %35, %cst_24 {dimension_numbers = #tpu.dot_dimension_numbers<[2], [1], [1], [2], [0, 0, 0, 1, 1, 2], [0], [0]>} : vector<1x8x8xf32>, vector<1x8x8xf32>, vector<1x8x8xf32> -> vector<1x8x8xf32>
    "tpu.trace_stop"() : () -> ()
    %37 = tpu.reciprocal %34 {approx = true} : vector<1x8x1xf32> -> vector<1x8x1xf32>
    %38 = arith.mulf %34, %37 : vector<1x8x1xf32>
    %cst_25 = arith.constant 2.000000e+00 : f32
    %39 = vector.broadcast %cst_25 : f32 to vector<1x8x1xf32>
    %40 = arith.subf %39, %38 : vector<1x8x1xf32>
    %41 = arith.mulf %37, %40 : vector<1x8x1xf32>
    %42 = vector.broadcast %41 : vector<1x8x1xf32> to vector<1x8x8xf32>
    %43 = arith.mulf %36, %42 : vector<1x8x8xf32>
    %44 = vector.extract_strided_slice %7 {offsets = [0, 0, 8], sizes = [1, 8, 8], strides = [1, 1, 1]} : vector<1x8x32xf32> to vector<1x8x8xf32>
    %45 = vector.extract_strided_slice %13 {offsets = [0, 0, 8], sizes = [1, 8, 8], strides = [1, 1, 1]} : vector<1x8x32xf32> to vector<1x8x8xf32>
    "tpu.trace_start"() <{level = 10 : i32, message = "bnd,bmd->bnm"}> : () -> ()
    %cst_26 = arith.constant dense<0.000000e+00> : vector<1x8x8xf32>
    %46 = tpu.matmul %44, %45, %cst_26 {dimension_numbers = #tpu.dot_dimension_numbers<[2], [2], [1], [1], [0, 0, 0, 1, 1, 1], [0], [0]>} : vector<1x8x8xf32>, vector<1x8x8xf32>, vector<1x8x8xf32> -> vector<1x8x8xf32>
    "tpu.trace_stop"() : () -> ()
    %47 = arith.addf %46, %23 : vector<1x8x8xf32>
    %cst_27 = arith.constant dense<0xFF800000> : vector<1x8xf32>
    %48 = vector.multi_reduction <maximumf>, %47, %cst_27 [2] : vector<1x8x8xf32> to vector<1x8xf32>
    %49 = vector.shape_cast %48 : vector<1x8xf32> to vector<1x8x1xf32>
    %50 = vector.broadcast %49 : vector<1x8x1xf32> to vector<1x8x8xf32>
    %51 = arith.subf %47, %50 : vector<1x8x8xf32>
    %52 = math.exp %51 : vector<1x8x8xf32>
    %cst_28 = arith.constant dense<0.000000e+00> : vector<1x8xf32>
    %53 = vector.multi_reduction <add>, %52, %cst_28 [2] : vector<1x8x8xf32> to vector<1x8xf32>
    %54 = vector.shape_cast %53 : vector<1x8xf32> to vector<1x8x1xf32>
    %55 = vector.extract_strided_slice %19 {offsets = [0, 0, 8], sizes = [1, 8, 8], strides = [1, 1, 1]} : vector<1x8x32xf32> to vector<1x8x8xf32>
    "tpu.trace_start"() <{level = 10 : i32, message = "bnm,bmd->bnd"}> : () -> ()
    %cst_29 = arith.constant dense<0.000000e+00> : vector<1x8x8xf32>
    %56 = tpu.matmul %52, %55, %cst_29 {dimension_numbers = #tpu.dot_dimension_numbers<[2], [1], [1], [2], [0, 0, 0, 1, 1, 2], [0], [0]>} : vector<1x8x8xf32>, vector<1x8x8xf32>, vector<1x8x8xf32> -> vector<1x8x8xf32>
    "tpu.trace_stop"() : () -> ()
    %57 = tpu.reciprocal %54 {approx = true} : vector<1x8x1xf32> -> vector<1x8x1xf32>
    %58 = arith.mulf %54, %57 : vector<1x8x1xf32>
    %cst_30 = arith.constant 2.000000e+00 : f32
    %59 = vector.broadcast %cst_30 : f32 to vector<1x8x1xf32>
    %60 = arith.subf %59, %58 : vector<1x8x1xf32>
    %61 = arith.mulf %57, %60 : vector<1x8x1xf32>
    %62 = vector.broadcast %61 : vector<1x8x1xf32> to vector<1x8x8xf32>
    %63 = arith.mulf %56, %62 : vector<1x8x8xf32>
    %64 = vector.extract_strided_slice %7 {offsets = [0, 0, 16], sizes = [1, 8, 8], strides = [1, 1, 1]} : vector<1x8x32xf32> to vector<1x8x8xf32>
    %65 = vector.extract_strided_slice %13 {offsets = [0, 0, 16], sizes = [1, 8, 8], strides = [1, 1, 1]} : vector<1x8x32xf32> to vector<1x8x8xf32>
    "tpu.trace_start"() <{level = 10 : i32, message = "bnd,bmd->bnm"}> : () -> ()
    %cst_31 = arith.constant dense<0.000000e+00> : vector<1x8x8xf32>
    %66 = tpu.matmul %64, %65, %cst_31 {dimension_numbers = #tpu.dot_dimension_numbers<[2], [2], [1], [1], [0, 0, 0, 1, 1, 1], [0], [0]>} : vector<1x8x8xf32>, vector<1x8x8xf32>, vector<1x8x8xf32> -> vector<1x8x8xf32>
    "tpu.trace_stop"() : () -> ()
    %67 = arith.addf %66, %23 : vector<1x8x8xf32>
    %cst_32 = arith.constant dense<0xFF800000> : vector<1x8xf32>
    %68 = vector.multi_reduction <maximumf>, %67, %cst_32 [2] : vector<1x8x8xf32> to vector<1x8xf32>
    %69 = vector.shape_cast %68 : vector<1x8xf32> to vector<1x8x1xf32>
    %70 = vector.broadcast %69 : vector<1x8x1xf32> to vector<1x8x8xf32>
    %71 = arith.subf %67, %70 : vector<1x8x8xf32>
    %72 = math.exp %71 : vector<1x8x8xf32>
    %cst_33 = arith.constant dense<0.000000e+00> : vector<1x8xf32>
    %73 = vector.multi_reduction <add>, %72, %cst_33 [2] : vector<1x8x8xf32> to vector<1x8xf32>
    %74 = vector.shape_cast %73 : vector<1x8xf32> to vector<1x8x1xf32>
    %75 = vector.extract_strided_slice %19 {offsets = [0, 0, 16], sizes = [1, 8, 8], strides = [1, 1, 1]} : vector<1x8x32xf32> to vector<1x8x8xf32>
    "tpu.trace_start"() <{level = 10 : i32, message = "bnm,bmd->bnd"}> : () -> ()
    %cst_34 = arith.constant dense<0.000000e+00> : vector<1x8x8xf32>
    %76 = tpu.matmul %72, %75, %cst_34 {dimension_numbers = #tpu.dot_dimension_numbers<[2], [1], [1], [2], [0, 0, 0, 1, 1, 2], [0], [0]>} : vector<1x8x8xf32>, vector<1x8x8xf32>, vector<1x8x8xf32> -> vector<1x8x8xf32>
    "tpu.trace_stop"() : () -> ()
    %77 = tpu.reciprocal %74 {approx = true} : vector<1x8x1xf32> -> vector<1x8x1xf32>
    %78 = arith.mulf %74, %77 : vector<1x8x1xf32>
    %cst_35 = arith.constant 2.000000e+00 : f32
    %79 = vector.broadcast %cst_35 : f32 to vector<1x8x1xf32>
    %80 = arith.subf %79, %78 : vector<1x8x1xf32>
    %81 = arith.mulf %77, %80 : vector<1x8x1xf32>
    %82 = vector.broadcast %81 : vector<1x8x1xf32> to vector<1x8x8xf32>
    %83 = arith.mulf %76, %82 : vector<1x8x8xf32>
    %84 = vector.extract_strided_slice %7 {offsets = [0, 0, 24], sizes = [1, 8, 8], strides = [1, 1, 1]} : vector<1x8x32xf32> to vector<1x8x8xf32>
    %85 = vector.extract_strided_slice %13 {offsets = [0, 0, 24], sizes = [1, 8, 8], strides = [1, 1, 1]} : vector<1x8x32xf32> to vector<1x8x8xf32>
    "tpu.trace_start"() <{level = 10 : i32, message = "bnd,bmd->bnm"}> : () -> ()
    %cst_36 = arith.constant dense<0.000000e+00> : vector<1x8x8xf32>
    %86 = tpu.matmul %84, %85, %cst_36 {dimension_numbers = #tpu.dot_dimension_numbers<[2], [2], [1], [1], [0, 0, 0, 1, 1, 1], [0], [0]>} : vector<1x8x8xf32>, vector<1x8x8xf32>, vector<1x8x8xf32> -> vector<1x8x8xf32>
    "tpu.trace_stop"() : () -> ()
    %87 = arith.addf %86, %23 : vector<1x8x8xf32>
    %cst_37 = arith.constant dense<0xFF800000> : vector<1x8xf32>
    %88 = vector.multi_reduction <maximumf>, %87, %cst_37 [2] : vector<1x8x8xf32> to vector<1x8xf32>
    %89 = vector.shape_cast %88 : vector<1x8xf32> to vector<1x8x1xf32>
    %90 = vector.broadcast %89 : vector<1x8x1xf32> to vector<1x8x8xf32>
    %91 = arith.subf %87, %90 : vector<1x8x8xf32>
    %92 = math.exp %91 : vector<1x8x8xf32>
    %cst_38 = arith.constant dense<0.000000e+00> : vector<1x8xf32>
    %93 = vector.multi_reduction <add>, %92, %cst_38 [2] : vector<1x8x8xf32> to vector<1x8xf32>
    %94 = vector.shape_cast %93 : vector<1x8xf32> to vector<1x8x1xf32>
    %95 = vector.extract_strided_slice %19 {offsets = [0, 0, 24], sizes = [1, 8, 8], strides = [1, 1, 1]} : vector<1x8x32xf32> to vector<1x8x8xf32>
    "tpu.trace_start"() <{level = 10 : i32, message = "bnm,bmd->bnd"}> : () -> ()
    %cst_39 = arith.constant dense<0.000000e+00> : vector<1x8x8xf32>
    %96 = tpu.matmul %92, %95, %cst_39 {dimension_numbers = #tpu.dot_dimension_numbers<[2], [1], [1], [2], [0, 0, 0, 1, 1, 2], [0], [0]>} : vector<1x8x8xf32>, vector<1x8x8xf32>, vector<1x8x8xf32> -> vector<1x8x8xf32>
    "tpu.trace_stop"() : () -> ()
    %97 = tpu.reciprocal %94 {approx = true} : vector<1x8x1xf32> -> vector<1x8x1xf32>
    %98 = arith.mulf %94, %97 : vector<1x8x1xf32>
    %cst_40 = arith.constant 2.000000e+00 : f32
    %99 = vector.broadcast %cst_40 : f32 to vector<1x8x1xf32>
    %100 = arith.subf %99, %98 : vector<1x8x1xf32>
    %101 = arith.mulf %97, %100 : vector<1x8x1xf32>
    %102 = vector.broadcast %101 : vector<1x8x1xf32> to vector<1x8x8xf32>
    %103 = arith.mulf %96, %102 : vector<1x8x8xf32>
    %104 = tpu.concatenate %43, %63, %83, %103 in 2 : vector<1x8x8xf32>, vector<1x8x8xf32>, vector<1x8x8xf32>, vector<1x8x8xf32> -> vector<1x8x32xf32>
    %105 = vector.shape_cast %104 : vector<1x8x32xf32> to vector<8x32xf32>
    %c0_41 = arith.constant 0 : index
    %c0_42 = arith.constant 0 : index
    %106 = vector.load %arg9[%c0_41, %c0_42] : memref<32x32xf32, #tpu.memory_space<vmem>>, vector<32x32xf32>
    %cst_43 = arith.constant dense<0.000000e+00> : vector<8x32xf32>
    %107 = tpu.matmul %105, %106, %cst_43 {dimension_numbers = #tpu.dot_dimension_numbers<[1], [0], [0], [1], [0, 0, 1, 1], [], []>} : vector<8x32xf32>, vector<32x32xf32>, vector<8x32xf32> -> vector<8x32xf32>
    %c0_44 = arith.constant 0 : index
    %c0_45 = arith.constant 0 : index
    %108 = vector.load %arg10[%c0_44, %c0_45] : memref<1x32xf32, #tpu.memory_space<vmem>>, vector<1x32xf32>
    %109 = vector.broadcast %108 : vector<1x32xf32> to vector<8x32xf32>
    %110 = arith.addf %107, %109 : vector<8x32xf32>
    %111 = vector.shape_cast %110 : vector<8x32xf32> to vector<1x8x32xf32>
    %c0_46 = arith.constant 0 : index
    %c0_47 = arith.constant 0 : index
    %c0_48 = arith.constant 0 : index
    %112 = vector.load %arg12[%c0_46, %c0_47, %c0_48] : memref<1x8x32xf32, #tpu.memory_space<vmem>>, vector<1x8x32xf32>
    tpu.vector_store %arg12[%c0_46, %c0_47, %c0_48], %111 {strides = array<i32>} : memref<1x8x32xf32, #tpu.memory_space<vmem>>, vector<1x8x32xf32>,
    return
  }
  func.func @transform_0(%arg0: i32) -> (i32, i32, i32) {
    %c0_i32 = arith.constant 0 : i32
    %c0_i32_0 = arith.constant 0 : i32
    %c0_i32_1 = arith.constant 0 : i32
    return %arg0, %c0_i32, %c0_i32_0 : i32, i32, i32
  }
  func.func @transform_1(%arg0: i32) -> (i32, i32, i32) {
    %c0_i32 = arith.constant 0 : i32
    %c0_i32_0 = arith.constant 0 : i32
    %c0_i32_1 = arith.constant 0 : i32
    return %arg0, %c0_i32, %c0_i32_0 : i32, i32, i32
  }
  func.func @transform_2(%arg0: i32) -> (i32, i32) {
    %c0_i32 = arith.constant 0 : i32
    %c0_i32_0 = arith.constant 0 : i32
    %c0_i32_1 = arith.constant 0 : i32
    return %c0_i32, %c0_i32_0 : i32, i32
  }
  func.func @transform_3(%arg0: i32) -> (i32, i32) {
    %c0_i32 = arith.constant 0 : i32
    %c0_i32_0 = arith.constant 0 : i32
    %c0_i32_1 = arith.constant 0 : i32
    return %c0_i32, %c0_i32_0 : i32, i32
  }
  func.func @transform_4(%arg0: i32) -> (i32, i32) {
    %c0_i32 = arith.constant 0 : i32
    %c0_i32_0 = arith.constant 0 : i32
    %c0_i32_1 = arith.constant 0 : i32
    return %c0_i32, %c0_i32_0 : i32, i32
  }
  func.func @transform_5(%arg0: i32) -> (i32, i32) {
    %c0_i32 = arith.constant 0 : i32
    %c0_i32_0 = arith.constant 0 : i32
    %c0_i32_1 = arith.constant 0 : i32
    return %c0_i32, %c0_i32_0 : i32, i32
  }
  func.func @transform_6(%arg0: i32) -> (i32, i32) {
    %c0_i32 = arith.constant 0 : i32
    %c0_i32_0 = arith.constant 0 : i32
    %c0_i32_1 = arith.constant 0 : i32
    return %c0_i32, %c0_i32_0 : i32, i32
  }
  func.func @transform_7(%arg0: i32) -> (i32, i32) {
    %c0_i32 = arith.constant 0 : i32
    %c0_i32_0 = arith.constant 0 : i32
    %c0_i32_1 = arith.constant 0 : i32
    return %c0_i32, %c0_i32_0 : i32, i32
  }
  func.func @transform_8(%arg0: i32) -> (i32, i32) {
    %c0_i32 = arith.constant 0 : i32
    %c0_i32_0 = arith.constant 0 : i32
    %c0_i32_1 = arith.constant 0 : i32
    return %c0_i32, %c0_i32_0 : i32, i32
  }
  func.func @transform_9(%arg0: i32) -> (i32, i32) {
    %c0_i32 = arith.constant 0 : i32
    %c0_i32_0 = arith.constant 0 : i32
    %c0_i32_1 = arith.constant 0 : i32
    return %c0_i32, %c0_i32_0 : i32, i32
  }
  func.func @transform_10(%arg0: i32) -> (i32, i32) {
    %c0_i32 = arith.constant 0 : i32
    %c0_i32_0 = arith.constant 0 : i32
    %c0_i32_1 = arith.constant 0 : i32
    return %c0_i32, %c0_i32_0 : i32, i32
  }
  func.func @transform_11(%arg0: i32) -> (i32, i32, i32) {
    %c0_i32 = arith.constant 0 : i32
    %c0_i32_0 = arith.constant 0 : i32
    %c0_i32_1 = arith.constant 0 : i32
    return %arg0, %c0_i32, %c0_i32_0 : i32, i32, i32
  }
}

</mosaic_0001>

<bundles_post_ra>
// kernel: tpu_custom_call.1
= control target key start
LH: loop header
LB: loop body
LE: loop exit
PB: predicated region body
PF: predicated region fallthrough
CT: control target
= control target key end

     0   :  { %s1818_s0 = inlined_call_operand.hbm [shape: f32[2,8,32], index: 0, kind: input, shape index: {}]   ;;  %s1819_s1 = inlined_call_operand.hbm [shape: f32[2,8,8], index: 1, kind: input, shape index: {}]   ;;  %s1820_s2 = inlined_call_operand.hbm [shape: f32[32,32], index: 2, kind: input, shape index: {}]   ;;  %s1821_s3 = inlined_call_operand.hbm [shape: f32[32,32], index: 3, kind: input, shape index: {}]   ;;  %s1822_s4 = inlined_call_operand.hbm [shape: f32[32,32], index: 4, kind: input, shape index: {}]   ;;  %s1823_s5 = inlined_call_operand.vmem [shape: f32[1,32], index: 5, kind: input, shape index: {}]   ;;  %s1824_s6 = inlined_call_operand.vmem [shape: f32[1,32], index: 6, kind: input, shape index: {}]   ;;  %s1825_s7 = inlined_call_operand.vmem [shape: f32[1,32], index: 7, kind: input, shape index: {}]   ;;  %s1826_s8 = inlined_call_operand.hbm [shape: f32[32,32], index: 8, kind: input, shape index: {}]   ;;  %s1827_s9 = inlined_call_operand.vmem [shape: f32[1,32], index: 9, kind: input, shape index: {}]   ;;  %s1828_s10 = inlined_call_operand.<no memory space> [shape: f32[1,1], index: 10, kind: input, shape index: {}]   ;;  %s1829_s11 = inlined_call_operand.hbm [shape: f32[2,8,32], index: 11, kind: output, shape index: {}]  }
   0x1   :  { %1835 = sst [smem:[#allocation26_spill]] %s1820_s2 }
   0x2   :  { %1836 = sst [smem:[#allocation27_spill]] %s1821_s3 }
   0x3   :  { %1837 = sst [smem:[#allocation28_spill]] %s1822_s4 }
   0x4   :  { %1838 = sst [smem:[#allocation29_spill]] %s1826_s8 }
   0x5   :  { %16 = sst [smem:[#allocation2]] %s1828_s10 }
   0x6   :  { %17 = vsyncpa [#allocation4], 0 }
   0x7   :  { %19 = vsyncpa [#allocation4 + $0x1], 0 }
   0x8   :  { %20 = vsyncpa [#allocation7], 0 }
   0x9   :  { %22 = vsyncpa [#allocation7 + $0x1], 0 }
   0xa   :  { %23 = vsyncpa [#allocation10], 0 }
   0xb   :  { %24 = vsyncpa [#allocation13], 0 }
   0xc   :  { %25 = vsyncpa [#allocation5], 0 }
   0xd   :  { %27 = vsyncpa [#allocation5 + $0x1], 0  ;;  %s1566_s19 = smov 0   ;;  %s1568_s20 = smov 0  }
   0xe   :  { %s1570_s21 = smov 0   ;;  %s1572_s22 = smov 0  }
   0xf LB: > { %1839 = sst [smem:[#allocation21_spill]] %s1485_s21  ;;  %s1590_s25 = sadd.s32 4294967295, %s1489_s22   ;;  %s1489_s22 = sphi %s1572_s22, %s1858_s22   ;;  %s1485_s21 = sphi %s1570_s21, %s1860_s21   ;;  %s1481_s20 = sphi %s1568_s20, %s1862_s20   ;;  %s1477_s19 = sphi %s1566_s19, %s1861_s19  }
  0x10   : > { %1840 = sst [smem:[#allocation22_spill]] %s1489_s22  ;;  %p1069_p0 = scmp.ge.s32.totalorder %s1489_s22, 1 }
  0x11   : > { %s1841_s2 = sld [smem:[#allocation26_spill]]  ;;  %p54_p1 = scmp.eq.s32.totalorder %s1590_s25, 0 }
  0x12   : > { %p305_p2 = scmp.lt.s32.totalorder %s1489_s22, 3  ;;  %s1491_s27 = smov [#allocation8]  }
  0x13   : > { %s318_s28 = sshll.u32 %s1491_s27, 4  ;;  %s1843_s3 = sld [smem:[#allocation27_spill]]  ;;  %s319_s28 = int_to_ptr.vmem [resolvable:$true] %s318_s28 }
  0x14   : > { %p1595_p3 = pnand %p1069_p0, %p305_p2  ;;  %s1845_s4 = sld [smem:[#allocation28_spill]] }
  0x15   : > { %s1492_s17 = smov [#allocation9]   ;;  %s1493_s10 = smov 128  }
  0x16   : > { %p1129_p4 = pneg %p1595_p3  ;;  %s332_s18 = sshll.u32 %s1492_s17, 4  ;;  %s333_s18 = int_to_ptr.vmem [resolvable:$true] %s332_s18 }
  0x17   : > { %s316_s24 = sshll.u32 %s1841_s2, 4  ;;  %s1494_s23 = smov 8   ;;  %s317_s24 = int_to_ptr.hbm [resolvable:$true] %s316_s24 }
  0x18   : > { %p1607_p6 = pnand %p1129_p4, %p54_p1  ;;  %s1846_s8 = sld [smem:[#allocation29_spill]] }
  0x19   : > { %s330_s12 = sshll.u32 %s1843_s3, 4  ;;  %s1495_s14 = smov [#allocation11]   ;;  %s331_s12 = int_to_ptr.hbm [resolvable:$true] %s330_s12 }
  0x1a   : > { %s344_s16 = sshll.u32 %s1845_s4, 4  ;;  %s346_s15 = sshll.u32 %s1495_s14, 4  ;;  %s345_s16 = int_to_ptr.hbm [resolvable:$true] %s344_s16  ;;  %s347_s15 = int_to_ptr.vmem [resolvable:$true] %s346_s15 }
  0x1b   : > { %1132 = dma.hbm_to_vmem [thread:$0]  (!%p1607_p6), %s317_s24, 512, %s319_s28, [#allocation7], %s1493_s10, %s1493_s10, %s1494_s23  }
  0x1c   : > { %1135 = dma.hbm_to_vmem [thread:$0]  (!%p1607_p6), %s331_s12, 512, %s333_s18, [#allocation10], %s1493_s10, %s1493_s10, %s1494_s23  }
  0x1d   : > { %1138 = dma.hbm_to_vmem [thread:$0]  (!%p1607_p6), %s345_s16, 512, %s347_s15, [#allocation10], %s1493_s10, %s1493_s10, %s1494_s23  }
  0x1e   : > { %s367_s30 = sshll.u32 %s1846_s8, 4  ;;  %s1496_s24 = smov [#allocation12]   ;;  %s368_s30 = int_to_ptr.hbm [resolvable:$true] %s367_s30 }
  0x1f   : > { %s369_s28 = sshll.u32 %s1496_s24, 4  ;;  %s1068_s12 = sadd.s32 4294967294, %s1489_s22   ;;  %s370_s28 = int_to_ptr.vmem [resolvable:$true] %s369_s28 }
  0x20   : > { %1141 = dma.hbm_to_vmem [thread:$0]  (!%p1607_p6), %s368_s30, 512, %s370_s28, [#allocation13], %s1493_s10, %s1493_s10, %s1494_s23  }
  0x21   : > { %s1627_s17 = sadd.s32 1, %s1489_s22   ;;  %s40_s27 = sadd.s32 1, %s1485_s21 }
  0x22   : > { %1847 = sst [smem:[#allocation23_spill]] %s1627_s17  ;;  %s37_s18 = ssub.s32 %s1489_s22, %s1627_s17 }
  0x23   : > { %p38_p7 = scmp.eq.s32.totalorder %s37_s18, 0  ;;  %p47_p8 = scmp.ne.s32.totalorder %s1485_s21, %s1481_s20 }
  0x24   : > { %p48_p9 = scmp.eq.s32.totalorder %s1489_s22, 0  ;;  %p53_p10 = scmp.ne.s32.totalorder %s1481_s20, %s1477_s19 }
  0x25   : > { %s1638_s16 = scalar_select %p38_p7, %s1485_s21, %s40_s27  }
  0x26   : > { %p1640_p11 = por %p48_p9, %p47_p8  ;;  %p1646_p12 = por %p54_p1, %p53_p10 }
  0x27   : > { %1848 = sst [smem:[#allocation24_spill]] %s1638_s16  ;;  %p292_p13 = scmp.eq.s32.totalorder %s1590_s25, 1 }
  0x28   : > { %p298_p0 = scmp.eq.s32.totalorder %s1068_s12, 1  ;;  %p1157_p2 = scmp.lt.s32.totalorder %s1489_s22, 2 }
  0x29   : > { %s389_s10 = sand.u32 1, %s1485_s21   ;;  %p1653_p4 = por %p292_p13, %p47_p8 }
  0x2a   : > { %p1657_p6 = por %p298_p0, %p53_p10  ;;  %s1661_s14 = sshll.u32 %s389_s10, 3 }
  0x2b   : > { %s1076_s15 = sshll.u32 %s1489_s22, 3  ;;  %s393_s27 = scalar_lea.vmem [#allocation3], %s1661_s14 }
  0x2c   : > { %s1852_s30 = scalar_select %p1657_p6, 1, 0 }
  0x2d   : > { %s397_s18 = scalar_lea.hbm %s1818_s0, %s1076_s15  ;;  %s401_s12 = sshll.u32 %s393_s27, 4  ;;  %s402_s12 = int_to_ptr.vmem [resolvable:$true] %s401_s12 }
  0x2e   : > { %1853 = sst [smem:[#allocation25_spill]] %s1852_s30  ;;  %s399_s2 = sshll.u32 %s397_s18, 4  ;;  %s400_s2 = int_to_ptr.hbm [resolvable:$true] %s399_s2 }
  0x2f   : > { %p1670_p7 = pnand %p1157_p2, %p1640_p11  ;;  %s416_s16 = scalar_lea.hbm %s1819_s1, %s1076_s15 }
  0x30   : > { %s408_s21 = sand.u32 1, %s1489_s22   ;;  %s390_s17 = scalar_lea.sflag [#allocation4], %s389_s10 }
  0x31   : > { %s1347_s24 = sshra.s32 %s400_s2, 4  ;;  %p1351_p9 = pneg %p1670_p7  ;;  %s1348_s24 = int_to_ptr.hbm [resolvable:$true] %s1347_s24 }
  0x32   : > { %s1349_s28 = scalar_lea.hbm %s1348_s24, 8  ;;  %s1354_s27 = scalar_lea.hbm %s1818_s0, 16 }
  0x33   : > { %p1350_p8 = scmp.ne.s32.totalorder %s1348_s24, %s1349_s28  ;;  %p1355_p13 = scmp.lt.s32.totalorder %s1348_s24, %s1818_s0 }
  0x34   : > { %p1356_p0 = scmp.lt.s32.totalorder %s1354_s27, %s1349_s28 }
  0x35   : > { %p1352_p10 = pnand %p1351_p9, %p1350_p8 }
  0x36   : > { %p1357_p2 = por %p1356_p0, %p1355_p13 }
  0x37   : > { %p1353_p11 = pneg %p1352_p10 }
  0x39   : > { %p1358_p5 = pnand %p1357_p2, %p1353_p11 }
  0x3b   : > { %1361 = shalt.err (!%p1358_p5)
}
  0x3c   : > { %1145 = dma.hbm_to_vmem [thread:$0]  (!%p1670_p7), %s400_s2, 128, %s402_s12, %s390_s17  }
  0x3d   : > { %s418_s10 = sshll.u32 %s416_s16, 4  ;;  %s412_s15 = scalar_lea.vmem [#allocation6], %s1661_s14  ;;  %s419_s10 = int_to_ptr.hbm [resolvable:$true] %s418_s10 }
  0x3e   : > { %s420_s22 = sshll.u32 %s412_s15, 4  ;;  %s409_s29 = scalar_lea.sflag [#allocation7], %s408_s21  ;;  %s421_s22 = int_to_ptr.vmem [resolvable:$true] %s420_s22 }
  0x3f   : > { %s1377_s18 = sshra.s32 %s419_s10, 4  ;;  %s1384_s27 = scalar_lea.hbm %s1819_s1, 16  ;;  %s1378_s18 = int_to_ptr.hbm [resolvable:$true] %s1377_s18 }
  0x40   : > { %s1379_s30 = scalar_lea.hbm %s1378_s18, 8  ;;  %p1385_p5 = scmp.lt.s32.totalorder %s1378_s18, %s1819_s1 }
  0x41   : > { %p1380_p8 = scmp.ne.s32.totalorder %s1378_s18, %s1379_s30  ;;  %p1386_p13 = scmp.lt.s32.totalorder %s1384_s27, %s1379_s30 }
  0x43   : > { %p1382_p10 = pnand %p1380_p8, %p1351_p9  ;;  %p1387_p0 = por %p1386_p13, %p1385_p5 }
  0x45   : > { %p1383_p11 = pneg %p1382_p10 }
  0x47   : > { %p1388_p2 = pnand %p1387_p0, %p1383_p11 }
  0x49   : > { %1391 = shalt.err (!%p1388_p2)
}
  0x4a   : > { %1148 = dma.hbm_to_vmem [thread:$0]  (!%p1670_p7), %s419_s10, 128, %s421_s22, %s409_s29  }
  0x4b   : > { %429 = sbr.rel (%p1595_p3) target bundleno = 1007 (0x3ef), region = 64  ;;  %s1706_s21 = sand.u32 (!%p1595_p3), 1, %s1481_s20  }
  0x4c   : > { %s1709_s17 = sshll.u32 (!%p1595_p3), %s1706_s21, 3  ;;  %s432_s16 = scalar_lea.sflag (!%p1595_p3), [#allocation4], %s1706_s21 }
  0x4d   : > { %s435_s30 = scalar_lea.vmem (!%p1595_p3), [#allocation3], %s1709_s17 }
  0x50   : > { %1452 = dma.done.wait (%p1646_p12), %s432_s16, 128  }
  0x51   : > { %1454 = vsyncadd (%p1646_p12), %s432_s16, 4294967168  ;;  %s441_s3 = sand.u32 1, %s1590_s25   ;;  %s445_s26 = scalar_lea.vmem [#allocation6], %s1709_s17 }
  0x52   : > { %s442_s22 = scalar_lea.sflag [#allocation7], %s441_s3 }
  0x53   : > { %1456 = dma.done.wait (%p1646_p12), %s442_s22, 128  }
  0x54   : > { %1458 = vsyncadd (%p1646_p12), %s442_s22, 4294967168 }
  0x55   : > { %1460 = dma.done.wait (%p54_p1), [#allocation7], 512  }
  0x56   : > { %1462 = vsyncadd (%p54_p1), [#allocation7], 4294966784 }
  0x57   : > { %1464 = dma.done.wait (%p54_p1), [#allocation10], 1024  }
  0x58   : > { %1466 = vsyncadd (%p54_p1), [#allocation10], 4294966272 }
  0x59   : > { %1468 = dma.done.wait (%p54_p1), [#allocation13], 512  }
  0x5a   : > { %1470 = vsyncadd (%p54_p1), [#allocation13], 4294966784  ;;  %v546_v0 = vld [vmem:[#allocation9 + $0x18] sm:$0xff]  ;;  %v545_v1 = vld [vmem:[#allocation9 + $0x10] sm:$0xff]  ;;  %vm519_vm0 = vcmask 261120   ;;  %vm603_vm1 = vcmask 64512  }
  0x5b   : > { %v514_v2 = vld [vmem:[#allocation8 + $0x18] sm:$0xff]  ;;  %563 = vmatpush.msra.mxu1 %v546_v0  ;;  %v513_v3 = vld [vmem:[#allocation8 + $0x10] sm:$0xff]  ;;  %v544_v4 = vld [vmem:[#allocation9 + $0x8] sm:$0xff]  ;;  %s1497_s10 = smov 104   ;;  %s1498_s15 = smov 120   ;;  %vm885_vm2 = vcmask 130048  }
  0x5c   : > { %535 = vmatpush.msra.mxu0 %v514_v2  ;;  %v512_v5 = vld [vmem:[#allocation8 + $0x8] sm:$0xff]  ;;  %v543_v6 = vld [vmem:[#allocation9] sm:$0xff]  ;;  %s1499_s29 = smov 112   ;;  %v574_v15 = vld [vmem:[#allocation11 + $0x18] sm:$0xff]  ;;  %s599_s18 = sld [smem:[#allocation2]]  ;;  %vm887_vm3 = vcmask 195584  }
  0x5d   : > { %564 = vmatpush.msra.mxu1 %v545_v1  ;;  %v511_v7 = vld [vmem:[#allocation8] sm:$0xff]  ;;  %v573_v16 = vld [vmem:[#allocation11 + $0x10] sm:$0xff]  ;;  %591 = vmatpush.msra.mxu2 %v574_v15  ;;  %v572_v17 = vld [vmem:[#allocation11 + $0x8] sm:$0xff]  ;;  %s1500_s27 = smov 8   ;;  %s1501_s4 = smov 24  }
  0x5e   : > { %536 = vmatpush.msra.mxu0 %v513_v3  ;;  %v510_v8 = vld [vmem:[%s435_s30] sm:$0xff]  ;;  %v600_v24 = vld [vmem:[%s445_s26] sm:$0xff]  ;;  %s1502_s2 = smov 16   ;;  %s1104_s16 = sshll.u32 %s1590_s25, 3 }
  0x5f   : > { %565 = vmatpush.msra.mxu1 %v544_v4  ;;  %v1207_v9 = vld [vmem:[%s1824_s6] ss:$0 sm:$0xff]  ;;  %592 = vmatpush.msra.mxu2 %v573_v16  ;;  %s932_s22 = scalar_lea.hbm %s1829_s11, %s1104_s16  ;;  %s509_s14 = scalar_lea.vmem [#allocation14], %s1709_s17 }
  0x60   : > { %537 = vmatpush.msra.mxu0 %v512_v5  ;;  %v1208_v10 = vld [vmem:[%s1823_s5] ss:$0 sm:$0xff]  ;;  %s934_s12 = sshll.u32 %s509_s14, 4  ;;  %s936_s8 = sshll.u32 %s932_s22, 4  ;;  %s935_s12 = int_to_ptr.vmem [resolvable:$true] %s934_s12  ;;  %s937_s8 = int_to_ptr.hbm [resolvable:$true] %s936_s8 }
  0x61   : > { %566 = vmatpush.msra.mxu1 %v543_v6  ;;  %v571_v18 = vld [vmem:[#allocation11] sm:$0xff]  ;;  %593 = vmatpush.msra.mxu2 %v572_v17  ;;  %s1421_s25 = sshra.s32 %s937_s8, 4  ;;  %s1427_s17 = scalar_lea.hbm %s1829_s11, 16  ;;  %s1422_s25 = int_to_ptr.hbm [resolvable:$true] %s1421_s25 }
  0x62   : > { %538 = vmatpush.msra.mxu0 %v511_v7  ;;  %1088 = vmatmul.msk.f32.vlgmr.msra.gmra.mxu1 %vm519_vm0, %v510_v8  ;;  %v601_v25 = vstv %s599_s18  ;;  %v1209_v31 = vld [vmem:[%s1825_s7] ss:$0 sm:$0xff]  ;;  %p1428_p7 = scmp.lt.s32.totalorder %s1422_s25, %s1829_s11 }
  0x63   : > { %1087 = vmatmul.msk.f32.vlgmr.msra.gmra.mxu0 %vm519_vm0, %v510_v8  ;;  %594 = vmatpush.msra.mxu2 %v571_v18  ;;  %v602_v27 = vmul.f32 %v601_v25, %v600_v24  ;;  %v892_v24 = vld [vmem:[#allocation12 + $0x18] sm:$0xff]  ;;  %v891_v25 = vld [vmem:[#allocation12 + $0x10] sm:$0xff] }
  0x64   : > { %1089 = vmatmul.msk.f32.vlgmr.msra.gmra.mxu2 %vm519_vm0, %v510_v8 }
  0xdf   : > { %v568_v11 = vpop.f32.mrf.mxu1 }
  0xe0   : > { %v540_v12 = vpop.f32.mrf.mxu0  ;;  %v569_v13 = vadd.f32 %v1207_v9, %v568_v11 }
  0xe1   : > { %v541_v14 = vadd.f32 %v1208_v10, %v540_v12 }
  0xe2   : > { %806 = vrot.lane.b32.xlu2 %v569_v13, %s1497_s10  ;;  %669 = vrot.lane.b32.xlu1 %v569_v13, %s1498_s15 }
  0xe3   : > { %738 = vrot.lane.b32.xlu0 %v569_v13, %s1499_s29  ;;  %1090 = vmatpush.xpose.msk.msra.mxu3 %vm603_vm1, %v569_v13 }
  0xe6   : > { %1091 = vmatmul.msk.f32.vlgmr.msra.gmra.mxu3 %vm603_vm1, %v541_v14 }
  0xe7   : > { %v596_v32 = vpop.f32.mrf.mxu2 }
  0xe8   : > { %v597_v33 = vadd.f32 %v1209_v31, %v596_v32 }
  0xea   : > { %804 = vrot.lane.b32.xlu2 %v541_v14, %s1497_s10  ;;  %667 = vrot.lane.b32.xlu1 %v541_v14, %s1498_s15 }
  0xeb   : > { %736 = vrot.lane.b32.xlu0 %v541_v14, %s1499_s29  ;;  %657 = vmatpush.msrb.mxu3 %v597_v33 }
 0x13c   : > { %v807_v20 = vpop.permute.xlu2 %806 }
 0x144   : > { %v805_v26 = vpop.permute.xlu2 %804 }
 0x154   : > { %v670_v19 = vpop.permute.xlu1 %669 }
 0x155   : > { %v739_v21 = vpop.permute.xlu0 %738  ;;  %1093 = vmatpush.xpose.msk.msrb.mxu0 %vm603_vm1, %v670_v19 }
 0x156   : > { %1096 = vmatpush.xpose.msk.msrb.mxu2 %vm603_vm1, %v739_v21 }
 0x159   : > { %1099 = vmatpush.xpose.msk.msra.mxu0 %vm603_vm1, %v807_v20 }
 0x15a   : > { %912 = vmatpush.msra.mxu2 %v892_v24 }
 0x15c   : > { %v668_v22 = vpop.permute.xlu1 %667  ;;  %913 = vmatpush.msra.mxu2 %v891_v25 }
 0x15d   : > { %v737_v23 = vpop.permute.xlu0 %736  ;;  %1094 = vmatmul.msk.f32.vlgmr.msrb.gmra.mxu0 %vm603_vm1, %v668_v22 }
 0x15e   : > { %1097 = vmatmul.msk.f32.vlgmr.msrb.gmra.mxu2 %vm603_vm1, %v737_v23 }
 0x165   : > { %1100 = vmatmul.msk.f32.vlgmr.msra.gmra.mxu0 %vm603_vm1, %v805_v26  ;;  %v890_v26 = vld [vmem:[#allocation12 + $0x8] sm:$0xff] }
 0x166   : > { %914 = vmatpush.msra.mxu2 %v890_v26 }
 0x169   : > { %v627_v28 = vpop.f32.mrf.mxu3 }
 0x16a   : > { %v628_v29 = vadd.f32 %v627_v28, %v602_v27 }
 0x16c   : > { %v630_v30 = vsel %vm603_vm1, %v628_v29, -inf }
 0x16d   : > { %631 = vmax.xlane.f32.xlu0 %v630_v30 }
 0x181   : > { %705 = vrot.lane.b32.xlu0 %v597_v33, %s1498_s15  ;;  %s1423_s15 = scalar_lea.hbm %s1422_s25, 8 }
 0x182   : > { %p1424_p1 = scmp.ne.s32.totalorder %s1422_s25, %s1423_s15  ;;  %p1429_p9 = scmp.lt.s32.totalorder %s1427_s17, %s1423_s15 }
 0x184   : > { %p1425_p3 = pnand %p1424_p1, %p1653_p4  ;;  %p1430_p8 = por %p1429_p9, %p1428_p7 }
 0x186   : > { %p1426_p12 = pneg %p1425_p3 }
 0x188   : > { %p1431_p10 = pnand %p1430_p8, %p1426_p12 }
 0x1da   : > { %v692_v34 = vpop.f32.mrf.mxu0 }
 0x1db   : > { %v693_v35 = vadd.f32 %v692_v34, %v602_v27 }
 0x1dd   : > { %v695_v36 = vsel %vm603_vm1, %v693_v35, -inf }
 0x1de   : > { %696 = vmax.xlane.f32.xlu1 %v695_v36 }
 0x1e0   : > { %v632_v37 = vpop.xlane.xlu0 %631 }
 0x1e1   : > { %v633_v38 = vsub.f32 %v628_v29, %v632_v37  ;;  %v761_v39 = vpop.f32.mrf.mxu2 }
 0x1e2   : > { %v762_v40 = vadd.f32 %v761_v39, %v602_v27  ;;  %v829_v43 = vpop.f32.mrf.mxu0 }
 0x1e3   : > { %v634_v41 = vmul.f32 1.442695, %v633_v38  ;;  %v830_v44 = vadd.f32 %v829_v43, %v602_v27  ;;  %v889_v27 = vld [vmem:[#allocation12] sm:$0xff] }
 0x1e4   : > { %v764_v42 = vsel %vm603_vm1, %v762_v40, -inf  ;;  %915 = vmatpush.msra.mxu2 %v889_v27 }
 0x1e5   : > { %1211 = vpow2.f32 %v634_v41  ;;  %765 = vmax.xlane.f32.xlu2 %v764_v42  ;;  %v832_v46 = vsel %vm603_vm1, %v830_v44, -inf }
 0x1eb   : > { %v1212_v45 = vpop.eup %1211 }
 0x1ec   : > { %1092 = vmatmul.msk.f32.vlgmr.msrb.gmra.mxu3 %vm603_vm1, %v1212_v45  ;;  %v636_v61 = vsel %vm603_vm1, %v1212_v45, 0.0 }
 0x1ed   : > { %833 = vmax.xlane.f32.xlu2 %v832_v46 }
 0x1f3   : > { %v706_v47 = vpop.permute.xlu0 %705 }
 0x1f4   : > { %726 = vmatpush.msrb.mxu1 %v706_v47 }
 0x1f7   : > { %773 = vrot.lane.b32.xlu1 %v597_v33, %s1499_s29 }
 0x205   : > { %841 = vrot.lane.b32.xlu2 %v597_v33, %s1497_s10  ;;  %s922_s10 = scalar_lea.sflag [#allocation5], %s1706_s21 }
 0x251   : > { %v697_v48 = vpop.xlane.xlu1 %696 }
 0x252   : > { %v698_v49 = vsub.f32 %v693_v35, %v697_v48 }
 0x254   : > { %v699_v50 = vmul.f32 1.442695, %v698_v49 }
 0x256   : > { %1213 = vpow2.f32 %v699_v50 }
 0x258   : > { %v766_v51 = vpop.xlane.xlu2 %765 }
 0x259   : > { %v767_v52 = vsub.f32 %v762_v40, %v766_v51  ;;  %v1210_v40 = vld [vmem:[%s1827_s9] ss:$0 sm:$0xff] }
 0x25b   : > { %v768_v53 = vmul.f32 1.442695, %v767_v52 }
 0x25c   : > { %v1214_v54 = vpop.eup %1213 }
 0x25d   : > { %1215 = vpow2.f32 %v768_v53  ;;  %1095 = vmatmul.msk.f32.vlgmr.msrb.gmra.mxu1 %vm603_vm1, %v1214_v54  ;;  %v701_v55 = vsel %vm603_vm1, %v1214_v54, 0.0 }
 0x25e   : > { %702 = vadd.xlane.f32.xlu0 %v701_v55 }
 0x260   : > { %v834_v56 = vpop.xlane.xlu2 %833 }
 0x261   : > { %v835_v57 = vsub.f32 %v830_v44, %v834_v56 }
 0x263   : > { %v1216_v58 = vpop.eup %1215  ;;  %v836_v59 = vmul.f32 1.442695, %v835_v57 }
 0x264   : > { %v770_v60 = vsel %vm603_vm1, %v1216_v58, 0.0 }
 0x265   : > { %1217 = vpow2.f32 %v836_v59  ;;  %771 = vadd.xlane.f32.xlu1 %v770_v60 }
 0x266   : > { %637 = vadd.xlane.f32.xlu0 %v636_v61 }
 0x268   : > { %v842_v62 = vpop.permute.xlu2 %841 }
 0x269   : > { %862 = vmatpush.msra.mxu1 %v842_v62  ;;  %v774_v63 = vpop.permute.xlu1 %773 }
 0x26a   : > { %794 = vmatpush.msra.mxu3 %v774_v63 }
 0x26b   : > { %v1218_v0 = vpop.eup %1217  ;;  %1098 = vmatmul.msk.f32.vlgmr.msra.gmra.mxu3 %vm603_vm1, %v1216_v58 }
 0x26c   : > { %1101 = vmatmul.msk.f32.vlgmr.msra.gmra.mxu1 %vm603_vm1, %v1218_v0  ;;  %v838_v1 = vsel %vm603_vm1, %v1218_v0, 0.0 }
 0x26d   : > { %839 = vadd.xlane.f32.xlu2 %v838_v1 }
 0x26f   : > { %v659_v13 = vpop.f32.mrf.mxu3 }
 0x2d1   : > { %v703_v2 = vpop.xlane.xlu0 %702 }
 0x2d2   : > { %1219 = vrcp.f32 %v703_v2 }
 0x2d8   : > { %v1220_v3 = vpop.eup %1219  ;;  %v772_v5 = vpop.xlane.xlu1 %771 }
 0x2d9   : > { %v732_v4 = vmul.f32 %v1220_v3, %v703_v2  ;;  %1221 = vrcp.f32 %v772_v5  ;;  %v638_v28 = vpop.xlane.xlu0 %637 }
 0x2da   : > { %v728_v8 = vpop.f32.mrf.mxu1 }
 0x2db   : > { %v733_v6 = vsub.f32 2.0, %v732_v4 }
 0x2dd   : > { %v734_v7 = vmul.f32 %v1220_v3, %v733_v6 }
 0x2df   : > { %v735_v9 = vmul.f32 %v734_v7, %v728_v8  ;;  %v1222_v11 = vpop.eup %1221 }
 0x2e0   : > { %v840_v10 = vpop.xlane.xlu2 %839  ;;  %v800_v12 = vmul.f32 %v1222_v11, %v772_v5 }
 0x2e1   : > { %1223 = vrcp.f32 %v840_v10  ;;  %873 = vrot.lane.b32.xlu1 %v735_v9, %s1500_s27 }
 0x2e2   : > { %v801_v16 = vsub.f32 2.0, %v800_v12  ;;  %1225 = vrcp.f32 %v638_v28 }
 0x2e4   : > { %v802_v20 = vmul.f32 %v1222_v11, %v801_v16 }
 0x2e7   : > { %v1224_v14 = vpop.eup %1223 }
 0x2e8   : > { %v868_v15 = vmul.f32 %v1224_v14, %v840_v10  ;;  %v1226_v29 = vpop.eup %1225 }
 0x2e9   : > { %v864_v19 = vpop.f32.mrf.mxu1  ;;  %v663_v30 = vmul.f32 %v1226_v29, %v638_v28 }
 0x2ea   : > { %v869_v17 = vsub.f32 2.0, %v868_v15 }
 0x2eb   : > { %v664_v31 = vsub.f32 2.0, %v663_v30 }
 0x2ec   : > { %v870_v18 = vmul.f32 %v1224_v14, %v869_v17 }
 0x2ed   : > { %v665_v32 = vmul.f32 %v1226_v29, %v664_v31 }
 0x2ee   : > { %v871_v21 = vmul.f32 %v870_v18, %v864_v19  ;;  %v796_v22 = vpop.f32.mrf.mxu3 }
 0x2ef   : > { %v803_v23 = vmul.f32 %v802_v20, %v796_v22  ;;  %v666_v34 = vmul.f32 %v665_v32, %v659_v13 }
 0x2f0   : > { %881 = vrot.lane.b32.xlu2 %v871_v21, %s1501_s4 }
 0x2f1   : > { %877 = vrot.lane.b32.xlu0 %v803_v23, %s1502_s2 }
 0x34a   : > { %v882_v37 = vpop.permute.xlu2 %881 }
 0x353   : > { %v874_v33 = vpop.permute.xlu1 %873 }
 0x354   : > { %v884_v35 = vsel %vm603_vm1, %v666_v34, %v874_v33 }
 0x363   : > { %v878_v36 = vpop.permute.xlu0 %877 }
 0x364   : > { %v886_v38 = vsel %vm885_vm2, %v884_v35, %v878_v36 }
 0x365   : > { %v888_v39 = vsel %vm887_vm3, %v886_v38, %v882_v37 }
 0x366   : > { %1102 = vmatmul.msk.f32.vlgmr.msra.gmra.mxu2 %vm519_vm0, %v888_v39 }
 0x3e9   : > { %v917_v41 = vpop.f32.mrf.mxu2 }
 0x3ea   : > { %v918_v42 = vadd.f32 %v1210_v40, %v917_v41 }
 0x3ec   : > { %920 = vst.msk [vmem:[%s509_s14] sm:$0xff] %vm519_vm0, %v918_v42 }
 0x3ed   : > { %1434 = shalt.err (!%p1431_p10)
}
 0x3ee   : > { %1127 = dma.vmem_to_hbm [thread:$0]  (%p1653_p4), %s935_s12, 128, %s937_s8, %s922_s10  }
 0x3ef PF: > { %s1856_s27 = sld [smem:[#allocation22_spill]]  ;;  %s948_s4 = sand.u32 1, %s1477_s19  }
 0x3f0   : > { %s949_s2 = scalar_lea.sflag [#allocation5], %s948_s4 }
 0x3f5   : > { %p1857_p11 = scmp.ge.s32.totalorder %s1856_s27, 2 }
 0x3f7   : > { %p1150_p5 = pnand %p1857_p11, %p1657_p6 }
 0x3f9   : > { %p1151_p13 = pneg %p1150_p5 }
 0x3fb   : > { %1472 = dma.done.wait (%p1151_p13), %s949_s2, 128  }
 0x3fc   : > { %1474 = vsyncadd (%p1151_p13), %s949_s2, 4294967168  ;;  %s1858_s22 = sld [smem:[#allocation23_spill]]  ;;  %s1861_s19 = smov %s1481_s20 }
 0x3fd   : > { %s1859_s16 = sld [smem:[#allocation21_spill]] }
 0x3fe   : > { %s1860_s21 = sld [smem:[#allocation24_spill]] }
 0x402   : > { %p30_p0 = scmp.ge.s32.totalorder %s1858_s22, 4  }
 0x403   : > { %s1862_s20 = smov %s1859_s16 }
 0x404   :  { %32 = sbr.rel (!%p30_p0) target bundleno = 15 (0xf), region = 138 }
 0x409   :  { %955 = vsyncpa [#allocation4], 1 }
 0x40a   :  { %957 = vsyncpa [#allocation4 + $0x1], 1 }
 0x40b   :  { %958 = vsyncpa [#allocation7], 1 }
 0x40c   :  { %960 = vsyncpa [#allocation7 + $0x1], 1 }
 0x40d   :  { %961 = vsyncpa [#allocation10], 1 }
 0x40e   :  { %962 = vsyncpa [#allocation13], 1 }
 0x40f   :  { %963 = vsyncpa [#allocation5], 1 }
 0x410   :  { %965 = vsyncpa [#allocation5 + $0x1], 1 }

</bundles_post_ra>
